<compile_context>
chip_gen: v5e
topology: v5e:2x2
jax: 0.10.0
libtpu: 0.0.40
codegen_flags: <defaults>
</compile_context>

<pallas_src>
import functools

import jax
import jax.numpy as jnp
from jax.experimental import pallas as pl
from jax.experimental.pallas import tpu as pltpu

LRELU_SLOPE = 0.1


def get_padding(kernel_size, dilation=1):
    return (kernel_size * dilation - dilation) // 2


def _round_up(x, m):
    return (x + m - 1) // m * m


def _cdiv(a, b):
    return (a + b - 1) // b


def _tpu_vmem_bytes():
    try:
        info = pltpu.get_tpu_info()
        for attr in ("vmem_capacity_bytes", "vmem_size_bytes", "vmem_bytes"):
            v = getattr(info, attr, None)
            if v:
                return int(v)
    except Exception:
        pass
    try:
        kind = jax.devices()[0].device_kind.lower()
        if "v7" in kind:
            return 64 << 20
    except Exception:
        pass
    return 128 << 20


def _default_tile_co():
    """256-row LHS tiles on 256-wide MXUs (v6e/v7x); 128 on v5e and older."""
    try:
        kind = jax.devices()[0].device_kind.lower()
    except Exception:
        return 128
    for old in ("v2", "v3", "v4", "v5"):
        if old in kind:
            return 128
    return 256


def _pick_tile_co(c_out):
    t = min(_default_tile_co(), c_out)
    while c_out % t:          # C_out is 1/32/128/512/1024, so this never iterates
        t -= 1
    return t


def _choose_hw_tile(hw, ck, batch):
    """Lane tile (multiple of 128).  Per-buffer budget is generation-aware:
    ~14 MiB on 128-MiB-VMEM parts (v5e/v6e), ~8 MiB on v7x (64 MiB per TC)."""
    vmem = _tpu_vmem_bytes()
    budget = (14 << 20) if vmem >= (100 << 20) else (8 << 20)
    t_max = max(256, min(4096, (budget // (ck * 2)) // 128 * 128))
    hw_r = _round_up(hw, 128)
    if hw_r <= t_max:
        # keep >=2 spatial tiles when batch==1 so a 2-TC chip (v7x) can shard the
        # "parallel" hw axis, but never shrink below ~1024 lanes (weight re-stream).
        if batch == 1 and hw_r >= 2048:
            return _round_up(_cdiv(hw_r, 2), 128)
        return hw_r
    # split into near-equal 128-aligned tiles so HW padding waste stays small
    n = _cdiv(hw_r, t_max)
    return _round_up(_cdiv(hw_r, n), 128)


def _vmem_limit(block_bytes):
    vmem = _tpu_vmem_bytes()
    cap = (96 << 20) if vmem >= (100 << 20) else (56 << 20)
    return int(min(max(block_bytes + (16 << 20), 32 << 20), cap))


# ----------------------------------------------------------------------------- kernels ---
def _conv_mm_kernel(x_ref, w_ref, b_ref, o_ref, *, slope, apply_act):
    # x_ref: (K*C_in, hw_tile) bf16 taps   w_ref: (tile_co, K*C_in) bf16
    # b_ref: (tile_co, 1) f32              o_ref: (tile_co, hw_tile)
    acc = jnp.dot(w_ref[...], x_ref[...], preferred_element_type=jnp.float32)
    acc = acc + b_ref[...]
    if apply_act:
        acc = jnp.where(acc >= 0.0, acc, slope * acc)
    o_ref[...] = acc.astype(o_ref.dtype)


def _conv_s1_halo_kernel(x_ref, halo_ref, w_ref, b_ref, o_ref, taps_ref, *,
                         K, W, slope, apply_act):
    # Stride-1 (K,1) conv with NO HBM im2col: the activation lane-tile stays resident
    # across the co (innermost) axis; lane-shifted taps are built once per spatial tile.
    # x_ref: (C_in, hw_tile) bf16    halo_ref: (C_in, 128) bf16 (next 128 lanes)
    # w_ref: (tile_co, K*C_in) bf16  b_ref: (tile_co, 1) f32
    # o_ref: (tile_co, hw_tile)      taps_ref: (K*C_in, hw_tile) bf16 scratch
    c_in, hw = x_ref.shape

    @pl.when(pl.program_id(2) == 0)
    def _build_taps():
        for k in range(K):
            off = k * W
            if off == 0:
                taps_ref[0:c_in, :] = x_ref[...]
            else:
                shifted = jnp.concatenate(
                    [x_ref[:, off:], halo_ref[:, :off]], axis=1)
                taps_ref[k * c_in:(k + 1) * c_in, :] = shifted

    acc = jnp.dot(w_ref[...], taps_ref[...], preferred_element_type=jnp.float32)
    acc = acc + b_ref[...]
    if apply_act:
        acc = jnp.where(acc >= 0.0, acc, slope * acc)
    o_ref[...] = acc.astype(o_ref.dtype)


def _post_conv_kernel(x_ref, halo_ref, w_ref, b_ref, o_ref, *, K, W, slope, apply_act):
    # C_out == 1 stride-1 conv as K matvecs on the resident tile; the K lane shifts are
    # applied to the tiny (1, hw) per-tap results instead of the (C_in, hw) activations.
    # x_ref: (C_in, hw_tile) bf16   halo_ref: (C_in, 128) bf16   w_ref: (8, C_in) bf16
    # b_ref: (1, 1) f32             o_ref: (1, hw_tile) f32
    hw = x_ref.shape[1]
    r_main = jnp.dot(w_ref[...], x_ref[...], preferred_element_type=jnp.float32)
    r_halo = jnp.dot(w_ref[...], halo_ref[...], preferred_element_type=jnp.float32)
    r = jnp.concatenate([r_main, r_halo], axis=1)                 # (8, hw + 128)
    acc = r[0:1, 0:hw]
    for k in range(1, K):
        off = k * W
        acc = acc + r[k:k + 1, off:off + hw]
    acc = acc + b_ref[...]
    if apply_act:
        acc = jnp.where(acc >= 0.0, acc, slope * acc)
    o_ref[...] = acc.astype(o_ref.dtype)


# ---------------------------------------------------------------------------- wrappers ---
def _conv_im2col(x, w2d, b2, K, stride, apply_act, out_dtype):
    """Strided (K,1) conv via HBM im2col + one folded MXU dot per tile (layers 1-4)."""
    B, C_in, H, W = x.shape
    C_out = w2d.shape[0]
    pad = get_padding(K, 1)
    H_pad = H + 2 * pad
    H_out = (H_pad - K) // stride + 1
    HW = H_out * W
    CK = K * C_in

    # layout glue: folded im2col taps, contraction ordered (k, ci) to match w2d
    xpad = jnp.pad(x.astype(jnp.bfloat16), ((0, 0), (0, 0), (pad, pad), (0, 0)))
    taps = jnp.stack(
        [xpad[:, :, k:k + stride * (H_out - 1) + 1:stride, :] for k in range(K)],
        axis=1,
    )                                                    # (B, K, C_in, H_out, W)
    x_flat = taps.reshape(B, CK, HW)

    hw_tile = _choose_hw_tile(HW, CK, B)
    HW_padded = _round_up(HW, hw_tile)
    if HW_padded != HW:
        x_flat = jnp.pad(x_flat, ((0, 0), (0, 0), (0, HW_padded - HW)))

    tile_co = _pick_tile_co(C_out)
    n_hw = HW_padded // hw_tile
    n_co = C_out // tile_co

    out_bytes = jnp.dtype(out_dtype).itemsize
    blk = (2 * CK * hw_tile * 2 + 2 * tile_co * CK * 2
           + 2 * tile_co * hw_tile * out_bytes + 2 * tile_co * 4)

    kernel = functools.partial(_conv_mm_kernel, slope=LRELU_SLOPE, apply_act=apply_act)
    out = pl.pallas_call(
        kernel,
        out_shape=jax.ShapeDtypeStruct((B, C_out, HW_padded), out_dtype),
        grid_spec=pltpu.PrefetchScalarGridSpec(
            num_scalar_prefetch=0,
            grid=(B, n_hw, n_co),        # co innermost: taps tile stays VMEM-resident
            in_specs=[
                pl.BlockSpec((pl.Squeezed(), CK, hw_tile), lambda b, hw, co: (b, 0, hw)),
                pl.BlockSpec((tile_co, CK), lambda b, hw, co: (co, 0)),
                pl.BlockSpec((tile_co, 1), lambda b, hw, co: (co, 0)),
            ],
            out_specs=pl.BlockSpec((pl.Squeezed(), tile_co, hw_tile),
                                   lambda b, hw, co: (b, co, hw)),
        ),
        compiler_params=pltpu.CompilerParams(
            dimension_semantics=("parallel", "parallel", "parallel"),
            vmem_limit_bytes=_vmem_limit(blk),
        ),
    )(x_flat, w2d, b2)

    if HW_padded != HW:
        out = out[:, :, :HW]
    return out.reshape(B, C_out, H_out, W)


def _conv_s1_halo(x, w2d, b2, K, apply_act, out_dtype):
    """Stride-1 (K,1) conv without HBM im2col (layer 5): resident lane block + 128-lane
    halo block; K lane-shifted taps built in a VMEM scratch once per spatial tile."""
    B, C_in, H, W = x.shape
    C_out = w2d.shape[0]
    pad = get_padding(K, 1)
    H_out = H
    HW = H_out * W
    CK = K * C_in
    assert (K - 1) * W <= 128, "halo path needs (K-1)*period <= 128"

    hw_tile = _choose_hw_tile(HW, CK, B)
    HW_padded = _round_up(HW, hw_tile)
    n_hw = HW_padded // hw_tile
    L_pad = HW_padded + 128                   # extra 128-lane halo block for the last tile
    L_real = (H + 2 * pad) * W

    xb = jnp.pad(x.astype(jnp.bfloat16), ((0, 0), (0, 0), (pad, pad), (0, 0)))
    x_flat = xb.reshape(B, C_in, L_real)
    x_flat = jnp.pad(x_flat, ((0, 0), (0, 0), (0, L_pad - L_real)))

    tile_co = _pick_tile_co(C_out)
    n_co = C_out // tile_co
    halo_blocks = hw_tile // 128

    out_bytes = jnp.dtype(out_dtype).itemsize
    blk = (2 * C_in * hw_tile * 2 + 2 * C_in * 128 * 2 + 2 * tile_co * CK * 2
           + 2 * tile_co * hw_tile * out_bytes + CK * hw_tile * 2 + C_in * hw_tile * 2)

    kernel = functools.partial(_conv_s1_halo_kernel, K=K, W=W,
                               slope=LRELU_SLOPE, apply_act=apply_act)
    # TODO(synk): if the weight stream is still exposed in xprof, add
    # pipeline_mode=pl.Buffered(3) to the weight BlockSpec only.
    out = pl.pallas_call(
        kernel,
        out_shape=jax.ShapeDtypeStruct((B, C_out, HW_padded), out_dtype),
        grid_spec=pltpu.PrefetchScalarGridSpec(
            num_scalar_prefetch=0,
            grid=(B, n_hw, n_co),
            in_specs=[
                pl.BlockSpec((pl.Squeezed(), C_in, hw_tile),
                             lambda b, hw, co: (b, 0, hw)),
                pl.BlockSpec((pl.Squeezed(), C_in, 128),
                             lambda b, hw, co: (b, 0, (hw + 1) * halo_blocks)),
                pl.BlockSpec((tile_co, CK), lambda b, hw, co: (co, 0)),
                pl.BlockSpec((tile_co, 1), lambda b, hw, co: (co, 0)),
            ],
            out_specs=pl.BlockSpec((pl.Squeezed(), tile_co, hw_tile),
                                   lambda b, hw, co: (b, co, hw)),
            scratch_shapes=[pltpu.VMEM((CK, hw_tile), jnp.bfloat16)],
        ),
        compiler_params=pltpu.CompilerParams(
            # co carries the taps scratch across steps -> must stay sequential
            dimension_semantics=("parallel", "parallel", "arbitrary"),
            vmem_limit_bytes=_vmem_limit(blk),
        ),
    )(x_flat, x_flat, w2d, b2)

    if HW_padded != HW:
        out = out[:, :, :HW]
    return out.reshape(B, C_out, H_out, W)


def _conv_post_s1(x, wp, b2, K, apply_act, out_dtype):
    """C_out == 1 stride-1 conv (conv_post) without im2col: K matvecs on a resident tile."""
    B, C_in, H, W = x.shape
    pad = get_padding(K, 1)
    HW = H * W
    assert (K - 1) * W <= 128

    hw_tile = _choose_hw_tile(HW, K * C_in, B)
    HW_padded = _round_up(HW, hw_tile)
    n_hw = HW_padded // hw_tile
    L_pad = HW_padded + 128
    L_real = (H + 2 * pad) * W

    xb = jnp.pad(x.astype(jnp.bfloat16), ((0, 0), (0, 0), (pad, pad), (0, 0)))
    x_flat = xb.reshape(B, C_in, L_real)
    x_flat = jnp.pad(x_flat, ((0, 0), (0, 0), (0, L_pad - L_real)))

    halo_blocks = hw_tile // 128
    blk = 2 * C_in * hw_tile * 2 + 2 * C_in * 128 * 2 + 8 * C_in * 2 + 2 * hw_tile * 4

    kernel = functools.partial(_post_conv_kernel, K=K, W=W,
                               slope=LRELU_SLOPE, apply_act=apply_act)
    out = pl.pallas_call(
        kernel,
        out_shape=jax.ShapeDtypeStruct((B, 1, HW_padded), out_dtype),
        grid_spec=pltpu.PrefetchScalarGridSpec(
            num_scalar_prefetch=0,
            grid=(B, n_hw),
            in_specs=[
                pl.BlockSpec((pl.Squeezed(), C_in, hw_tile), lambda b, hw: (b, 0, hw)),
                pl.BlockSpec((pl.Squeezed(), C_in, 128),
                             lambda b, hw: (b, 0, (hw + 1) * halo_blocks)),
                pl.BlockSpec((8, C_in), lambda b, hw: (0, 0)),
                pl.BlockSpec((1, 1), lambda b, hw: (0, 0)),
            ],
            out_specs=pl.BlockSpec((pl.Squeezed(), 1, hw_tile), lambda b, hw: (b, 0, hw)),
        ),
        compiler_params=pltpu.CompilerParams(
            dimension_semantics=("parallel", "parallel"),
            vmem_limit_bytes=_vmem_limit(blk),
        ),
    )(x_flat, x_flat, wp, b2)

    if HW_padded != HW:
        out = out[:, :, :HW]
    return out.reshape(B, 1, H, W)


# ------------------------------------------------------------------------- full module ---
class DiscriminatorP:
    def __init__(self, period, kernel_size=5, stride=3, key=None):
        self.period = period
        self.kernel_size = kernel_size
        self.stride = stride
        chans = [(1, 32), (32, 128), (128, 512), (512, 1024), (1024, 1024)]
        strides = [stride, stride, stride, stride, 1]
        key = jax.random.PRNGKey(0) if key is None else key

        # NOTE: weight_norm/spectral_norm only reparametrize the weight tensor; the
        # effective forward weight is a plain (C_out, C_in, K, 1) tensor, which is what
        # we initialize here directly (deterministic synthetic init).
        self.raw = []          # f32 weights, used by the pure-JAX reference
        self.layers = []       # pre-folded bf16 weights for the Pallas kernels
        for (cin, cout), s in zip(chans, strides):
            key, kw, kb = jax.random.split(key, 3)
            w = 0.02 * jax.random.normal(kw, (cout, cin, kernel_size), jnp.float32)
            b = 0.02 * jax.random.normal(kb, (cout,), jnp.float32)
            self.raw.append((w, b, kernel_size, s))
            # contraction ordered (k, ci): w2d[co, k*cin + ci] = w[co, ci, k]
            w2d = jnp.transpose(w, (0, 2, 1)).reshape(cout, kernel_size * cin)
            self.layers.append(dict(
                w2d=w2d.astype(jnp.bfloat16),
                b=b.reshape(cout, 1).astype(jnp.float32),
                K=kernel_size, stride=s, cin=cin, cout=cout))

        key, kw, kb = jax.random.split(key, 3)
        pw = 0.02 * jax.random.normal(kw, (1, 1024, 3), jnp.float32)
        pb = 0.02 * jax.random.normal(kb, (1,), jnp.float32)
        self.raw.append((pw, pb, 3, 1))
        kp, cip = pw.shape[2], pw.shape[1]
        wp = jnp.zeros((8, cip), jnp.float32).at[:kp].set(jnp.transpose(pw[0], (1, 0)))
        self.post = dict(
            wp=wp.astype(jnp.bfloat16),
            w2d=jnp.transpose(pw, (0, 2, 1)).reshape(1, kp * cip).astype(jnp.bfloat16),
            b=pb.reshape(1, 1).astype(jnp.float32),
            K=kp, stride=1, cin=cip, cout=1)

    def _conv(self, x, p, apply_act, out_dtype):
        W = x.shape[-1]
        halo_ok = (p["K"] - 1) * W <= 128
        if p["stride"] == 1 and halo_ok and p["cout"] == 1:
            return _conv_post_s1(x, p["wp"], p["b"], p["K"], apply_act, out_dtype)
        if p["stride"] == 1 and halo_ok and p["cin"] >= 128:
            return _conv_s1_halo(x, p["w2d"], p["b"], p["K"], apply_act, out_dtype)
        return _conv_im2col(x, p["w2d"], p["b"], p["K"], p["stride"],
                            apply_act, out_dtype)

    def __call__(self, x):
        # x: (B, C=1, T) float32
        fmap = []
        b, c, t = x.shape
        if t % self.period != 0:
            n_pad = self.period - t % self.period
            x = jnp.pad(x, ((0, 0), (0, 0), (0, n_pad)), mode="reflect")
            t = t + n_pad
        x = x.reshape(b, c, t // self.period, self.period)           # (B, C, H, W)

        for p in self.layers:
            # intermediate activations in bf16: halves inter-layer HBM traffic and the
            # next layer feeds the MXU in bf16 anyway (fmap precision becomes bf16).
            x = self._conv(x, p, apply_act=True, out_dtype=jnp.bfloat16)
            fmap.append(x)

        x = self._conv(x, self.post, apply_act=False, out_dtype=jnp.float32)
        fmap.append(x)

        x = x.reshape(b, -1)                                          # torch.flatten(x, 1, -1)
        return x, fmap


# --------------------------------------------------------------------- pure-JAX reference ---
def _reference_forward(disc, x):
    fmap = []
    b, c, t = x.shape
    if t % disc.period != 0:
        n_pad = disc.period - t % disc.period
        x = jnp.pad(x, ((0, 0), (0, 0), (0, n_pad)), mode="reflect")
        t = t + n_pad
    x = x.reshape(b, c, t // disc.period, disc.period)
    n = len(disc.raw)
    for i, (w, bias, K, s) in enumerate(disc.raw):
        pad = get_padding(K, 1)
        y = jax.lax.conv_general_dilated(
            x.astype(jnp.float32), w[..., None],
            window_strides=(s, 1), padding=((pad, pad), (0, 0)),
            dimension_numbers=("NCHW", "OIHW", "NCHW"),
            precision=jax.lax.Precision.HIGHEST)
        y = y + bias.reshape(1, -1, 1, 1)
        if i < n - 1:
            y = jnp.where(y >= 0.0, y, LRELU_SLOPE * y)
        fmap.append(y)
        x = y
    return x.reshape(b, -1), fmap


if __name__ == "__main__":
    key = jax.random.PRNGKey(0)
    k_in, k_par = jax.random.split(key)

    # small shapes: batch=2, channels=1, seq=16, period=3 (exercises the reflect-pad path)
    x = jax.random.normal(k_in, (2, 1, 16), jnp.float32)

    disc = DiscriminatorP(period=3, kernel_size=5, stride=3, key=k_par)
    out, fmap = disc(x)

    jax.block_until_ready(out)
    for f in fmap:
        jax.block_until_ready(f)

    assert out.shape == (2, 3), out.shape
    assert len(fmap) == 6, len(fmap)

    # loose tolerance check vs a pure-JAX f32 reference (kernels run bf16 on the MXU)
    ref_out, ref_fmap = _reference_forward(disc, x)
    assert jnp.allclose(out, ref_out, atol=5e-3, rtol=1e-1), (
        float(jnp.max(jnp.abs(out - ref_out))))
    for f, rf in zip(fmap, ref_fmap):
        assert f.shape == rf.shape, (f.shape, rf.shape)
        assert jnp.allclose(f.astype(jnp.float32), rf, atol=5e-3, rtol=1e-1), (
            float(jnp.max(jnp.abs(f.astype(jnp.float32) - rf))))

    print("KERNEL_OK")
</pallas_src>

<mosaic_0001>
module attributes {stable_mosaic.version = 11 : i64} {
  func.func @_conv_mm_kernel(%arg0: i32, %arg1: i32, %arg2: i32, %arg3: memref<1x5x128xbf16, #tpu.memory_space<vmem>>, %arg4: memref<32x5xbf16, #tpu.memory_space<vmem>>, %arg5: memref<32x1xf32, #tpu.memory_space<vmem>>, %arg6: memref<1x32x128xbf16, #tpu.memory_space<vmem>>) attributes {dimension_semantics = [#tpu.dimension_semantics<parallel>, #tpu.dimension_semantics<parallel>, #tpu.dimension_semantics<parallel>], iteration_bounds = array<i64: 2, 1, 1>, scalar_prefetch = 0 : i64, scratch_operands = 0 : i64, tpu.core_type = #tpu.core_type<tc>, window_params = [{transform_indices = @transform_0, window_bounds = array<i64: 1, 5, 128>}, {transform_indices = @transform_1, window_bounds = array<i64: 32, 5>}, {transform_indices = @transform_2, window_bounds = array<i64: 32, 1>}, {transform_indices = @transform_3, window_bounds = array<i64: 1, 32, 128>}]} {
    %c0 = arith.constant 0 : index
    %c0_0 = arith.constant 0 : index
    %0 = vector.load %arg4[%c0, %c0_0] : memref<32x5xbf16, #tpu.memory_space<vmem>>, vector<32x5xbf16>
    %c0_1 = arith.constant 0 : index
    %c0_2 = arith.constant 0 : index
    %c0_3 = arith.constant 0 : index
    %1 = vector.load %arg3[%c0_1, %c0_2, %c0_3] : memref<1x5x128xbf16, #tpu.memory_space<vmem>>, vector<1x5x128xbf16>
    %2 = vector.shape_cast %1 : vector<1x5x128xbf16> to vector<5x128xbf16>
    %cst = arith.constant dense<0.000000e+00> : vector<32x128xf32>
    %3 = tpu.matmul %0, %2, %cst {dimension_numbers = #tpu.dot_dimension_numbers<[1], [0], [0], [1], [0, 0, 1, 1], [], []>} : vector<32x5xbf16>, vector<5x128xbf16>, vector<32x128xf32> -> vector<32x128xf32>
    %c0_4 = arith.constant 0 : index
    %c0_5 = arith.constant 0 : index
    %4 = vector.load %arg5[%c0_4, %c0_5] : memref<32x1xf32, #tpu.memory_space<vmem>>, vector<32x1xf32>
    %5 = vector.broadcast %4 : vector<32x1xf32> to vector<32x128xf32>
    %6 = arith.addf %3, %5 : vector<32x128xf32>
    %cst_6 = arith.constant 0.000000e+00 : f32
    %7 = vector.broadcast %cst_6 : f32 to vector<32x128xf32>
    %8 = arith.cmpf oge, %6, %7 : vector<32x128xf32>
    %cst_7 = arith.constant 1.000000e-01 : f32
    %9 = vector.broadcast %cst_7 : f32 to vector<32x128xf32>
    %10 = arith.mulf %9, %6 : vector<32x128xf32>
    %11 = arith.select %8, %6, %10 : vector<32x128xi1>, vector<32x128xf32>
    %12 = arith.truncf %11 : vector<32x128xf32> to vector<32x128xbf16>
    %c0_8 = arith.constant 0 : index
    %c0_9 = arith.constant 0 : index
    %c0_10 = arith.constant 0 : index
    %13 = vector.load %arg6[%c0_8, %c0_9, %c0_10] : memref<1x32x128xbf16, #tpu.memory_space<vmem>>, vector<1x32x128xbf16>
    %14 = vector.shape_cast %13 : vector<1x32x128xbf16> to vector<32x128xbf16>
    %15 = vector.shape_cast %12 : vector<32x128xbf16> to vector<1x32x128xbf16>
    tpu.vector_store %arg6[%c0_8, %c0_9, %c0_10], %15 {strides = array<i32>} : memref<1x32x128xbf16, #tpu.memory_space<vmem>>, vector<1x32x128xbf16>,
    return
  }
  func.func @transform_0(%arg0: i32, %arg1: i32, %arg2: i32) -> (i32, i32, i32) {
    %c0_i32 = arith.constant 0 : i32
    %c0_i32_0 = arith.constant 0 : i32
    return %arg0, %c0_i32, %arg1 : i32, i32, i32
  }
  func.func @transform_1(%arg0: i32, %arg1: i32, %arg2: i32) -> (i32, i32) {
    %c0_i32 = arith.constant 0 : i32
    %c0_i32_0 = arith.constant 0 : i32
    return %arg2, %c0_i32 : i32, i32
  }
  func.func @transform_2(%arg0: i32, %arg1: i32, %arg2: i32) -> (i32, i32) {
    %c0_i32 = arith.constant 0 : i32
    %c0_i32_0 = arith.constant 0 : i32
    return %arg2, %c0_i32 : i32, i32
  }
  func.func @transform_3(%arg0: i32, %arg1: i32, %arg2: i32) -> (i32, i32, i32) {
    %c0_i32 = arith.constant 0 : i32
    return %arg0, %arg2, %arg1 : i32, i32, i32
  }
}

</mosaic_0001>

<bundles_post_ra>
// kernel: tpu_custom_call.1
= control target key start
LH: loop header
LB: loop body
LE: loop exit
PB: predicated region body
PF: predicated region fallthrough
CT: control target
= control target key end

     0   :  { %8 = vsyncpa [#allocation3], 0  ;;  %s790_s0 = inlined_call_operand.vmem [shape: bf16[2,5,128], index: 0, kind: input, shape index: {}]   ;;  %s791_s1 = inlined_call_operand.vmem [shape: bf16[32,5], index: 1, kind: input, shape index: {}]   ;;  %s792_s2 = inlined_call_operand.vmem [shape: f32[32,1], index: 2, kind: input, shape index: {}]   ;;  %s793_s3 = inlined_call_operand.hbm [shape: bf16[2,32,128], index: 3, kind: output, shape index: {}]  }
   0x1   :  { %10 = vsyncpa [#allocation3 + $0x1], 0  ;;  %s671_s12 = smov 0   ;;  %s673_s13 = smov 0  }
   0x2   :  { %s675_s14 = smov 0   ;;  %s677_s15 = smov 0  }
   0x3   :  { %s679_s16 = smov 0   ;;  %s681_s17 = smov 0  }
   0x4 LB: > { %s467_s18 = sadd.s32 4294967295, %s645_s17   ;;  %s468_s19 = sadd.s32 4294967294, %s645_s17   ;;  %s645_s17 = sphi %s681_s17, %s16_s17   ;;  %s641_s16 = sphi %s679_s16, %s800_s16   ;;  %s637_s15 = sphi %s677_s15, %s799_s15   ;;  %s633_s14 = sphi %s675_s14, %s798_s14   ;;  %s629_s13 = sphi %s673_s13, %s797_s13   ;;  %s625_s12 = sphi %s671_s12, %s796_s12  }
   0x5   : > { %s35_s20 = sadd.s32 1, %s641_s16  ;;  %s126_s21 = sadd.s32 1, %s633_s14 }
   0x6   : > { %p37_p0 = scmp.ge.s32.totalorder %s35_s20, 2  ;;  %p136_p1 = scmp.ne.s32.totalorder %s633_s14, %s629_s13 }
   0x7   : > { %p137_p2 = scmp.eq.s32.totalorder %s467_s18, 1  ;;  %p142_p3 = scmp.ne.s32.totalorder %s629_s13, %s625_s12 }
   0x8   : > { %s802_s20 = smov (%p37_p0, %s35_s20), 0  ;;  %p143_p5 = scmp.eq.s32.totalorder %s468_s19, 1 }
   0x9   : > { %p711_p4 = por %p137_p2, %p136_p1  ;;  %s119_s23 = ssub.s32 %s641_s16, %s802_s20 }
   0xa   : > { %p473_p6 = scmp.ge.s32.totalorder %s645_s17, 1  ;;  %p124_p7 = scmp.eq.s32.totalorder %s119_s23, 0 }
   0xb   : > { %p718_p8 = por %p143_p5, %p142_p3  ;;  %p189_p9 = scmp.lt.s32.totalorder %s645_s17, 3 }
   0xc   : > { %s724_s25 = scalar_select %p124_p7, %s633_s14, %s126_s21  }
   0xd   : > { %p190_p10 = pnand %p473_p6, %p189_p9 }
   0xe   : > { %p225_p11 = scmp.lt.s32.totalorder (!%p190_p10), %s637_s15, 1  ;;  %s222_s26 = sand.u32 (!%p190_p10), 1, %s629_s13  }
   0xf   : > { %193 = sbr.rel (%p190_p10) target bundleno = 176 (0xb0), region = 32  ;;  %s474_s27 = sshll.u32 (!%p190_p10), %s222_s26, 4 }
  0x10   : > { %s493_s28 = sshll.u32 (!%p190_p10), %s637_s15, 4  ;;  %s224_s5 = scalar_lea.vmem (!%p190_p10), [#allocation2], %s474_s27 }
  0x11   : > { %s354_s6 = sshll.u32 (!%p190_p10), %s224_s5, 4  ;;  %s587_s18 = scalar_lea.hbm (!%p190_p10), %s793_s3, 32  ;;  %s355_s6 = int_to_ptr.vmem [resolvable:$true] %s354_s6 }
  0x14   : > { %vm292_vm0 = vcmask 1041408   ;;  %vm293_vm1 = vcmask 1042432   ;;  %v647_v0 = vmov 65535   ;;  %v253_v2 = vld [vmem:[%s792_s2 + $0x10] sm:$0xff]  ;;  %v251_v3 = vld [vmem:[%s792_s2] sm:$0xff]  ;;  %s226_s30 = scalar_select %p225_p11, %s637_s15, 1 }
  0x15   : > { %v294_v1 = vsel %vm292_vm0, 4294967295, %v647_v0  ;;  %v648_v4 = vmov 0   ;;  %v491_v8 = vld [vmem:[%s791_s1] sm:$0xff]  ;;  %v492_v9 = vld [vmem:[%s791_s1 + $0x8] sm:$0xff]  ;;  %v254_v10 = vld [vmem:[%s792_s2 + $0x18] sm:$0xff]  ;;  %vm285_vm2 = vcmask 39936  }
  0x16   : > { %566 = vset.pattern.permute.xlu1 %v648_v4  ;;  %565 = vset.pattern.permute.xlu0 %v648_v4  ;;  %s475_s4 = sshll.u32 %s226_s30, 2  ;;  %v295_v5 = vsel %vm293_vm1, %v294_v1, 0  ;;  %v252_v11 = vld [vmem:[%s792_s2 + $0x8] sm:$0xff] }
  0x17   : > { %267 = vperm.xlu1 %566, %v253_v2   ;;  %257 = vperm.xlu0 %565, %v251_v3   ;;  %s231_s7 = scalar_lea.vmem %s790_s0, %s475_s4  ;;  %s353_s4 = scalar_lea.hbm %s793_s3, %s493_s28 }
  0x18   : > { %v250_v6 = vld [vmem:[%s231_s7] sm:$0x7]  ;;  %s356_s15 = sshll.u32 %s353_s4, 4  ;;  %s339_s7 = scalar_lea.sflag [#allocation3], %s222_s26  ;;  %s357_s15 = int_to_ptr.hbm [resolvable:$true] %s356_s15 }
  0x19   : > { %v297_v7 = vand.u32 %v295_v5, %v250_v6  ;;  %s581_s8 = sshra.s32 %s357_s15, 4  ;;  %s582_s8 = int_to_ptr.hbm [resolvable:$true] %s581_s8 }
  0x1a   : > { %s583_s9 = scalar_lea.hbm %s582_s8, 16  ;;  %p588_p1 = scmp.lt.s32.totalorder %s582_s8, %s793_s3 }
  0x1b   : > { %306 = vmatpush.bf16.msra.mxu0 %v297_v7  ;;  %505 = vmatpush.bf16.msra.mxu1 %v297_v7  ;;  %p584_p12 = scmp.ne.s32.totalorder %s582_s8, %s583_s9  ;;  %p589_p2 = scmp.lt.s32.totalorder %s587_s18, %s583_s9 }
  0x1d   : > { %p585_p13 = pnand %p584_p12, %p711_p4  ;;  %p590_p3 = por %p589_p2, %p588_p1 }
  0x1e   : > { %484 = vmatmul.msk.bf16.vlgmr.msra.gmra.mxu0 %vm285_vm2, %v491_v8  ;;  %485 = vmatmul.msk.bf16.vlgmr.msra.gmra.mxu1 %vm285_vm2, %v492_v9 }
  0x1f   : > { %272 = vperm.xlu1 %566, %v254_v10   ;;  %262 = vperm.xlu0 %565, %v252_v11   ;;  %p586_p0 = pneg %p585_p13 }
  0x21   : > { %p591_p5 = pnand %p590_p3, %p586_p0 }
  0x89   : > { %v268_v12 = vpop.permute.xlu1 %267  ;;  %v258_v13 = vpop.permute.xlu0 %257 }
  0x91   : > { %v273_v18 = vpop.permute.xlu1 %272  ;;  %v263_v19 = vpop.permute.xlu0 %262 }
  0x9b   : > { %v308_v14 = vpop.f32.mrf.mxu0  ;;  %v313_v15 = vpop.f32.mrf.mxu1 }
  0x9c   : > { %v309_v16 = vadd.f32 %v308_v14, %v258_v13  ;;  %v314_v17 = vadd.f32 %v313_v15, %v268_v12 }
  0x9e   : > { %v322_v22 = vmul.f32 0.1, %v309_v16  ;;  %v324_v23 = vmul.f32 0.1, %v314_v17  ;;  %vm318_vm3 = vcmp.ge.f32.partialorder %v309_v16, 0.0  ;;  %vm320_vm4 = vcmp.ge.f32.partialorder %v314_v17, 0.0 }
  0xa0   : > { %v326_v28 = vsel %vm318_vm3, %v309_v16, %v322_v22  ;;  %v328_v29 = vsel %vm320_vm4, %v314_v17, %v324_v23 }
  0xa3   : > { %v310_v20 = vpop.f32.mrf.mxu0  ;;  %v315_v21 = vpop.f32.mrf.mxu1 }
  0xa4   : > { %v311_v24 = vadd.f32 %v310_v20, %v263_v19  ;;  %v316_v25 = vadd.f32 %v315_v21, %v273_v18 }
  0xa6   : > { %vm319_vm5 = vcmp.ge.f32.partialorder %v311_v24, 0.0  ;;  %v323_v26 = vmul.f32 0.1, %v311_v24  ;;  %vm321_vm6 = vcmp.ge.f32.partialorder %v316_v25, 0.0  ;;  %v325_v27 = vmul.f32 0.1, %v316_v25 }
  0xa8   : > { %v327_v30 = vsel %vm319_vm5, %v311_v24, %v323_v26  ;;  %v329_v31 = vsel %vm321_vm6, %v316_v25, %v325_v27 }
  0xa9   : > { %v497_v32 = vpack.c.bf16 %v327_v30, %v326_v28  ;;  %v502_v33 = vpack.c.bf16 %v329_v31, %v328_v29 }
  0xab   : > { %498 = vst [vmem:[%s224_s5] sm:$0xff] %v497_v32  }
  0xac   : > { %504 = vst [vmem:[%s224_s5 + $0x8] sm:$0xff] %v502_v33  }
  0xad   : > { %594 = shalt.err (!%p591_p5)
}
  0xae   : > { %s649_s23 = smov 64   ;;  %s650_s26 = smov 4  }
  0xaf   : > { %506 = dma.vmem_to_hbm [thread:$0]  (%p711_p4), %s355_s6, 256, %s357_s15, %s339_s7, %s649_s23, %s649_s23, %s650_s26  }
  0xb0 PF: > { %p512_p6 = scmp.ge.s32.totalorder %s645_s17, 2  ;;  %s371_s27 = sand.u32 1, %s625_s12  }
  0xb1   : > { %s372_s28 = scalar_lea.sflag [#allocation3], %s371_s27 }
  0xb2   : > { %p509_p7 = pnand %p512_p6, %p718_p8 }
  0xb4   : > { %p510_p9 = pneg %p509_p7 }
  0xb6   : > { %620 = dma.done.wait (%p510_p9), %s372_s28, 256  }
  0xb7   : > { %622 = vsyncadd (%p510_p9), %s372_s28, 4294967040  ;;  %s16_s17 = sadd.s32 1, %s645_s17   ;;  %s796_s12 = smov %s629_s13 }
  0xb8   : > { %p13_p10 = scmp.ge.s32.totalorder %s16_s17, 4   ;;  %s797_s13 = smov %s633_s14 }
  0xb9   : > { %s798_s14 = smov %s724_s25  ;;  %s799_s15 = smov %s641_s16 }
  0xba   : > { %s800_s16 = smov %s802_s20  ;;  %15 = sbr.rel (!%p13_p10) target bundleno = 4 (0x4), region = 73 }
  0xbf   :  { %378 = vsyncpa [#allocation3], 1 }
  0xc0   :  { %380 = vsyncpa [#allocation3 + $0x1], 1 }

</bundles_post_ra>
